<compile_context>
chip_gen: v7x
topology: tpu7x:2x2x1
jax: 0.10.0
libtpu: 0.0.40
codegen_flags: <defaults>
</compile_context>

<pallas_src>
import functools

import jax
import jax.numpy as jnp
from jax import lax
from jax.experimental import pallas as pl
from jax.experimental.pallas import tpu as pltpu


def _conv_factor_kernel(x_ref, dwt_ref, pww_ref, pwb_ref, o_ref, scr_ref,
                        *, layers, ksize, channels):
    # x_ref:   (H, WL)          packed activations, WL = N*W*C (lane-dense)
    # dwt_ref: (L*K*K, WL)      depthwise tap weights, per-lane tiled,
    #                           W-boundary (SAME) zeroing folded in (src side)
    # pww_ref: (L*C, WL)        pointwise weights, one row per cyclic shift s
    # pwb_ref: (L, WL)          pointwise bias with depthwise bias folded in
    # o_ref:   (H, WL)
    # scr_ref: (H + 2P, WL)     vertically zero-padded resident activation
    H, WL = x_ref.shape
    K, C = ksize, channels
    P = K // 2

    # Zero only the halo rows; interior is overwritten by the input copy.
    scr_ref[pl.ds(0, P), :] = jnp.zeros((P, WL), jnp.float32)
    scr_ref[pl.ds(P + H, P), :] = jnp.zeros((P, WL), jnp.float32)
    scr_ref[pl.ds(P, H), :] = x_ref[...].astype(jnp.float32)

    # Within-channel-group selection masks for the pointwise (layer-invariant,
    # computed once and broadcast-hoisted out of the layer loop).
    c_lane = lax.broadcasted_iota(jnp.int32, (1, WL), 1) % C
    pw_masks = [jnp.broadcast_to(c_lane < (C - s), (H, WL))
                for s in range(1, C)]

    for l in range(layers):
        # ---- depthwise KxK conv: column sums first, then K-1 lane rolls ----
        cols = [None] * K
        x_in = None
        for i in range(K):                      # vertical tap: static row slice
            xs = scr_ref[pl.ds(i, H), :]
            if i == P:
                x_in = xs                       # residual input (reuse load)
            for j in range(K):
                w = dwt_ref[pl.ds(l * K * K + i * K + j, 1), :]
                term = xs * w                   # boundary zeros folded into w
                cols[j] = term if cols[j] is None else cols[j] + term
        acc = cols[P]
        for j in range(K):                      # horizontal tap: lane rotation
            dj = j - P
            if dj != 0:
                acc = acc + pltpu.roll(cols[j], shift=(-dj * C) % WL, axis=1)

        # ---- pointwise 1x1 conv (VPU) + residual + folded biases -----------
        y = x_in + pwb_ref[pl.ds(l, 1), :] + acc * pww_ref[pl.ds(l * C, 1), :]
        for s in range(1, C):
            a = pltpu.roll(acc, shift=WL - s, axis=1)   # acc[lane + s]
            b = pltpu.roll(acc, shift=C - s, axis=1)    # acc[lane + s - C]
            y = y + jnp.where(pw_masks[s - 1], a, b) * \
                pww_ref[pl.ds(l * C + s, 1), :]

        y = jnp.maximum(y, 0.0)                 # act = ReLU
        if l == layers - 1:
            o_ref[...] = y.astype(o_ref.dtype)  # last layer: write output slab
        else:
            scr_ref[pl.ds(P, H), :] = y         # stays resident for next layer


def conv_factor_forward(x_nhwc, params):
    """Fused conv_factor forward.

    x_nhwc: (N, H, W, C).
    params: list (one per sic layer) of
      (dw_w (k,k,C), dw_b (C,), pw_w (C_out,C_in)=(C,C), pw_b (C,)).
    Only odd kernel sizes (the module's 'SAME' padding) are supported.
    """
    N, H, W, C = x_nhwc.shape
    L = len(params)
    K = params[0][0].shape[0]
    assert K % 2 == 1, "conv_factor: only odd kernel sizes are supported"
    P = K // 2
    WL = N * W * C                       # packed lane dim (batch folded in);
    # WL a multiple of 128 gives unmasked full-width stores (perf only).

    # Pack activations: (N,H,W,C) -> (H, N*W*C), lane = n*W*C + w*C + c.
    x2d = jnp.transpose(x_nhwc, (1, 0, 2, 3)).reshape(H, WL).astype(jnp.float32)

    # Pre-tile weights/biases to dense (rows, WL) lane vectors.
    lane = jnp.arange(WL)
    w_of_lane = (lane // C) % W
    c_grp = jnp.arange(C)

    dwt_rows, pww_rows, pwb_rows = [], [], []
    for (dw_w, dw_b, pw_w, pw_b) in params:
        for i in range(K):
            for j in range(K):
                dj = j - P
                # SRC-side validity: this lane is rolled by -dj*C into
                # destination column (w - dj); zero it if that column is
                # outside [0, W)  (folds the horizontal 'SAME' padding).
                valid = ((w_of_lane - dj) >= 0) & ((w_of_lane - dj) < W)
                dwt_rows.append(jnp.tile(dw_w[i, j, :], N * W)
                                * valid.astype(jnp.float32))
        for s in range(C):
            # w[c_out, (c_out + s) % C], tiled per lane (same value for both
            # select branches; the in-group mask in the kernel picks the data).
            pww_rows.append(jnp.tile(pw_w[c_grp, (c_grp + s) % C], N * W))
        # Depthwise bias folded into the pointwise bias: pw_b + pw_w @ dw_b.
        pwb_rows.append(jnp.tile(pw_b + pw_w @ dw_b, N * W))

    dwt = jnp.stack(dwt_rows)            # (L*K*K, WL)
    pww = jnp.stack(pww_rows)            # (L*C,   WL)
    pwb = jnp.stack(pwb_rows)            # (L,     WL)

    kernel = functools.partial(_conv_factor_kernel,
                               layers=L, ksize=K, channels=C)
    y2d = pl.pallas_call(
        kernel,
        out_shape=jax.ShapeDtypeStruct((H, WL), x_nhwc.dtype),
        grid_spec=pltpu.PrefetchScalarGridSpec(
            num_scalar_prefetch=0,
            grid=(1,),
            in_specs=[
                pl.BlockSpec((H, WL), lambda i: (0, 0)),
                pl.BlockSpec((L * K * K, WL), lambda i: (0, 0)),
                pl.BlockSpec((L * C, WL), lambda i: (0, 0)),
                pl.BlockSpec((L, WL), lambda i: (0, 0)),
            ],
            out_specs=pl.BlockSpec((H, WL), lambda i: (0, 0)),
            scratch_shapes=[pltpu.VMEM((H + 2 * P, WL), jnp.float32)],
        ),
        compiler_params=pltpu.CompilerParams(
            dimension_semantics=("arbitrary",),
            vmem_limit_bytes=32 * 1024 * 1024),
    )(x2d, dwt, pww, pwb)

    # Unpack: (H, N*W*C) -> (N, H, W, C).
    return jnp.transpose(y2d.reshape(H, N, W, C), (1, 0, 2, 3))


# ---------------- pure-JAX reference (for correctness check) ----------------
def _ref_sic(x, dw_w, dw_b, pw_w, pw_b):
    N, H, W, C = x.shape
    k = dw_w.shape[0]
    rhs_dw = dw_w.reshape(k, k, 1, C)                     # HWIO, groups=C
    y = lax.conv_general_dilated(
        x, rhs_dw, window_strides=(1, 1), padding="SAME",
        dimension_numbers=("NHWC", "HWIO", "NHWC"),
        feature_group_count=C) + dw_b
    rhs_pw = pw_w.T.reshape(1, 1, C, C)                   # (1,1,Cin,Cout)
    y = lax.conv_general_dilated(
        y, rhs_pw, window_strides=(1, 1), padding="SAME",
        dimension_numbers=("NHWC", "HWIO", "NHWC")) + pw_b
    return jnp.maximum(y + x, 0.0)


def _ref_forward(x, params):
    y = x
    for (dw_w, dw_b, pw_w, pw_b) in params:
        y = _ref_sic(y, dw_w, dw_b, pw_w, pw_b)
    return y


# ---------------------------------- main ------------------------------------
if __name__ == "__main__":
    N, C, H, W = 2, 4, 16, 16       # PyTorch NCHW convention for the input
    kernel_size = 3
    sic_layer = 2

    key = jax.random.PRNGKey(0)
    key, kx = jax.random.split(key)
    x_nchw = jax.random.normal(kx, (N, C, H, W), jnp.float32)

    # Deterministic parameter init (matches PyTorch Conv2d shapes):
    #   depthwise Conv2d(C, C, k, groups=C): weight (C,1,k,k) -> (k,k,C), bias (C,)
    #   pointwise Conv2d(C, C, 1):           weight (C,C,1,1) -> (C,C),   bias (C,)
    params = []
    for _ in range(sic_layer):
        key, k1, k2, k3, k4 = jax.random.split(key, 5)
        b_dw = 1.0 / (kernel_size * kernel_size) ** 0.5
        b_pw = 1.0 / C ** 0.5
        dw_w = jax.random.uniform(k1, (kernel_size, kernel_size, C),
                                  jnp.float32, -b_dw, b_dw)
        dw_b = jax.random.uniform(k2, (C,), jnp.float32, -b_dw, b_dw)
        pw_w = jax.random.uniform(k3, (C, C), jnp.float32, -b_pw, b_pw)
        pw_b = jax.random.uniform(k4, (C,), jnp.float32, -b_pw, b_pw)
        params.append((dw_w, dw_b, pw_w, pw_b))

    # NCHW -> NHWC for the kernel wrapper.
    x_nhwc = jnp.transpose(x_nchw, (0, 2, 3, 1))

    out_nhwc = conv_factor_forward(x_nhwc, params)
    out_nhwc = jax.block_until_ready(out_nhwc)

    ref_nhwc = _ref_forward(x_nhwc, params)
    assert jnp.allclose(out_nhwc, ref_nhwc, atol=1e-4, rtol=1e-4), (
        float(jnp.max(jnp.abs(out_nhwc - ref_nhwc))))

    # Back to NCHW to match the PyTorch output convention.
    out_nchw = jnp.transpose(out_nhwc, (0, 3, 1, 2))
    jax.block_until_ready(out_nchw)

    print("KERNEL_OK")
</pallas_src>

<mosaic_0001>
module attributes {stable_mosaic.version = 11 : i64} {
  func.func @_conv_factor_kernel(%arg0: i32, %arg1: memref<16x128xf32, #tpu.memory_space<vmem>>, %arg2: memref<18x128xf32, #tpu.memory_space<vmem>>, %arg3: memref<8x128xf32, #tpu.memory_space<vmem>>, %arg4: memref<2x128xf32, #tpu.memory_space<vmem>>, %arg5: memref<16x128xf32, #tpu.memory_space<vmem>>, %arg6: memref<18x128xf32, #tpu.memory_space<vmem>>) attributes {dimension_semantics = [#tpu.dimension_semantics<arbitrary>], iteration_bounds = array<i64: 1>, scalar_prefetch = 0 : i64, scratch_operands = 1 : i64, tpu.core_type = #tpu.core_type<tc>, window_params = [{pipeline_mode = #tpu.pipeline_mode<synchronous>, transform_indices = @transform_0, window_bounds = array<i64: 16, 128>}, {pipeline_mode = #tpu.pipeline_mode<synchronous>, transform_indices = @transform_1, window_bounds = array<i64: 18, 128>}, {pipeline_mode = #tpu.pipeline_mode<synchronous>, transform_indices = @transform_2, window_bounds = array<i64: 8, 128>}, {pipeline_mode = #tpu.pipeline_mode<synchronous>, transform_indices = @transform_3, window_bounds = array<i64: 2, 128>}, {pipeline_mode = #tpu.pipeline_mode<synchronous>, transform_indices = @transform_4, window_bounds = array<i64: 16, 128>}]} {
    %cst = arith.constant 0.000000e+00 : f32
    %0 = vector.broadcast %cst : f32 to vector<1x128xf32>
    %c0 = arith.constant 0 : index
    %c0_0 = arith.constant 0 : index
    %1 = vector.load %arg6[%c0, %c0_0] : memref<18x128xf32, #tpu.memory_space<vmem>>, vector<1x128xf32>
    tpu.vector_store %arg6[%c0, %c0_0], %0 {strides = array<i32>} : memref<18x128xf32, #tpu.memory_space<vmem>>, vector<1x128xf32>,
    %cst_1 = arith.constant 0.000000e+00 : f32
    %2 = vector.broadcast %cst_1 : f32 to vector<1x128xf32>
    %c17 = arith.constant 17 : index
    %c0_2 = arith.constant 0 : index
    %3 = vector.load %arg6[%c17, %c0_2] : memref<18x128xf32, #tpu.memory_space<vmem>>, vector<1x128xf32>
    tpu.vector_store %arg6[%c17, %c0_2], %2 {strides = array<i32>} : memref<18x128xf32, #tpu.memory_space<vmem>>, vector<1x128xf32>,
    %c0_3 = arith.constant 0 : index
    %c0_4 = arith.constant 0 : index
    %4 = vector.load %arg1[%c0_3, %c0_4] : memref<16x128xf32, #tpu.memory_space<vmem>>, vector<16x128xf32>
    %c1 = arith.constant 1 : index
    %c0_5 = arith.constant 0 : index
    %5 = vector.load %arg6[%c1, %c0_5] : memref<18x128xf32, #tpu.memory_space<vmem>>, vector<16x128xf32>
    tpu.vector_store %arg6[%c1, %c0_5], %4 {strides = array<i32>} : memref<18x128xf32, #tpu.memory_space<vmem>>, vector<16x128xf32>,
    %6 = tpu.iota {dimensions = array<i32: 1>} : vector<1x128xi32>
    %c4_i32 = arith.constant 4 : i32
    %c0_i32 = arith.constant 0 : i32
    %7 = arith.cmpi eq, %c4_i32, %c0_i32 : i32
    %c1_i32 = arith.constant 1 : i32
    %8 = arith.select %7, %c1_i32, %c4_i32 : i32
    %9 = vector.broadcast %8 : i32 to vector<1x128xi32>
    %10 = arith.remsi %6, %9 : vector<1x128xi32>
    %c0_i32_6 = arith.constant 0 : i32
    %11 = vector.broadcast %c0_i32_6 : i32 to vector<1x128xi32>
    %12 = arith.cmpi ne, %10, %11 : vector<1x128xi32>
    %c0_i32_7 = arith.constant 0 : i32
    %13 = vector.broadcast %c0_i32_7 : i32 to vector<1x128xi32>
    %14 = arith.cmpi slt, %10, %13 : vector<1x128xi32>
    %c0_i32_8 = arith.constant 0 : i32
    %15 = arith.cmpi slt, %8, %c0_i32_8 : i32
    %16 = vector.broadcast %15 : i1 to vector<1x128xi1>
    %17 = vector.broadcast %16 : vector<1x128xi1> to vector<1x128xi1>
    %18 = arith.xori %14, %17 : vector<1x128xi1>
    %19 = arith.andi %18, %12 : vector<1x128xi1>
    %20 = vector.broadcast %8 : i32 to vector<1x128xi32>
    %21 = arith.addi %10, %20 : vector<1x128xi32>
    %22 = arith.select %19, %21, %10 : vector<1x128xi1>, vector<1x128xi32>
    %c3_i32 = arith.constant 3 : i32
    %23 = vector.broadcast %c3_i32 : i32 to vector<1x128xi32>
    %24 = arith.cmpi slt, %22, %23 : vector<1x128xi32>
    %25 = vector.shape_cast %24 : vector<1x128xi1> to vector<1x128xi1>
    %26 = vector.broadcast %25 : vector<1x128xi1> to vector<16x128xi1>
    %c2_i32 = arith.constant 2 : i32
    %27 = vector.broadcast %c2_i32 : i32 to vector<1x128xi32>
    %28 = arith.cmpi slt, %22, %27 : vector<1x128xi32>
    %29 = vector.shape_cast %28 : vector<1x128xi1> to vector<1x128xi1>
    %30 = vector.broadcast %29 : vector<1x128xi1> to vector<16x128xi1>
    %c1_i32_9 = arith.constant 1 : i32
    %31 = vector.broadcast %c1_i32_9 : i32 to vector<1x128xi32>
    %32 = arith.cmpi slt, %22, %31 : vector<1x128xi32>
    %33 = vector.shape_cast %32 : vector<1x128xi1> to vector<1x128xi1>
    %34 = vector.broadcast %33 : vector<1x128xi1> to vector<16x128xi1>
    %c0_10 = arith.constant 0 : index
    %c0_11 = arith.constant 0 : index
    %35 = vector.load %arg6[%c0_10, %c0_11] : memref<18x128xf32, #tpu.memory_space<vmem>>, vector<16x128xf32>
    %c0_12 = arith.constant 0 : index
    %c0_13 = arith.constant 0 : index
    %36 = vector.load %arg2[%c0_12, %c0_13] : memref<18x128xf32, #tpu.memory_space<vmem>>, vector<1x128xf32>
    %37 = vector.broadcast %36 : vector<1x128xf32> to vector<16x128xf32>
    %38 = arith.mulf %35, %37 : vector<16x128xf32>
    %c1_14 = arith.constant 1 : index
    %c0_15 = arith.constant 0 : index
    %39 = vector.load %arg2[%c1_14, %c0_15] : memref<18x128xf32, #tpu.memory_space<vmem>>, vector<1x128xf32>
    %40 = vector.broadcast %39 : vector<1x128xf32> to vector<16x128xf32>
    %41 = arith.mulf %35, %40 : vector<16x128xf32>
    %c2 = arith.constant 2 : index
    %c0_16 = arith.constant 0 : index
    %42 = vector.load %arg2[%c2, %c0_16] : memref<18x128xf32, #tpu.memory_space<vmem>>, vector<1x128xf32>
    %43 = vector.broadcast %42 : vector<1x128xf32> to vector<16x128xf32>
    %44 = arith.mulf %35, %43 : vector<16x128xf32>
    %c1_17 = arith.constant 1 : index
    %c0_18 = arith.constant 0 : index
    %45 = vector.load %arg6[%c1_17, %c0_18] : memref<18x128xf32, #tpu.memory_space<vmem>>, vector<16x128xf32>
    %c3 = arith.constant 3 : index
    %c0_19 = arith.constant 0 : index
    %46 = vector.load %arg2[%c3, %c0_19] : memref<18x128xf32, #tpu.memory_space<vmem>>, vector<1x128xf32>
    %47 = vector.broadcast %46 : vector<1x128xf32> to vector<16x128xf32>
    %48 = arith.mulf %45, %47 : vector<16x128xf32>
    %49 = arith.addf %38, %48 : vector<16x128xf32>
    %c4 = arith.constant 4 : index
    %c0_20 = arith.constant 0 : index
    %50 = vector.load %arg2[%c4, %c0_20] : memref<18x128xf32, #tpu.memory_space<vmem>>, vector<1x128xf32>
    %51 = vector.broadcast %50 : vector<1x128xf32> to vector<16x128xf32>
    %52 = arith.mulf %45, %51 : vector<16x128xf32>
    %53 = arith.addf %41, %52 : vector<16x128xf32>
    %c5 = arith.constant 5 : index
    %c0_21 = arith.constant 0 : index
    %54 = vector.load %arg2[%c5, %c0_21] : memref<18x128xf32, #tpu.memory_space<vmem>>, vector<1x128xf32>
    %55 = vector.broadcast %54 : vector<1x128xf32> to vector<16x128xf32>
    %56 = arith.mulf %45, %55 : vector<16x128xf32>
    %57 = arith.addf %44, %56 : vector<16x128xf32>
    %c2_22 = arith.constant 2 : index
    %c0_23 = arith.constant 0 : index
    %58 = vector.load %arg6[%c2_22, %c0_23] : memref<18x128xf32, #tpu.memory_space<vmem>>, vector<16x128xf32>
    %c6 = arith.constant 6 : index
    %c0_24 = arith.constant 0 : index
    %59 = vector.load %arg2[%c6, %c0_24] : memref<18x128xf32, #tpu.memory_space<vmem>>, vector<1x128xf32>
    %60 = vector.broadcast %59 : vector<1x128xf32> to vector<16x128xf32>
    %61 = arith.mulf %58, %60 : vector<16x128xf32>
    %62 = arith.addf %49, %61 : vector<16x128xf32>
    %c7 = arith.constant 7 : index
    %c0_25 = arith.constant 0 : index
    %63 = vector.load %arg2[%c7, %c0_25] : memref<18x128xf32, #tpu.memory_space<vmem>>, vector<1x128xf32>
    %64 = vector.broadcast %63 : vector<1x128xf32> to vector<16x128xf32>
    %65 = arith.mulf %58, %64 : vector<16x128xf32>
    %66 = arith.addf %53, %65 : vector<16x128xf32>
    %c8 = arith.constant 8 : index
    %c0_26 = arith.constant 0 : index
    %67 = vector.load %arg2[%c8, %c0_26] : memref<18x128xf32, #tpu.memory_space<vmem>>, vector<1x128xf32>
    %68 = vector.broadcast %67 : vector<1x128xf32> to vector<16x128xf32>
    %69 = arith.mulf %58, %68 : vector<16x128xf32>
    %70 = arith.addf %57, %69 : vector<16x128xf32>
    %c4_i32_27 = arith.constant 4 : i32
    %71 = tpu.dynamic_rotate %62 by %c4_i32_27 dim 1 : vector<16x128xf32>, i32 -> vector<16x128xf32>
    %72 = arith.addf %66, %71 : vector<16x128xf32>
    %c124_i32 = arith.constant 124 : i32
    %73 = tpu.dynamic_rotate %70 by %c124_i32 dim 1 : vector<16x128xf32>, i32 -> vector<16x128xf32>
    %74 = arith.addf %72, %73 : vector<16x128xf32>
    %c0_28 = arith.constant 0 : index
    %c0_29 = arith.constant 0 : index
    %75 = vector.load %arg4[%c0_28, %c0_29] : memref<2x128xf32, #tpu.memory_space<vmem>>, vector<1x128xf32>
    %76 = vector.broadcast %75 : vector<1x128xf32> to vector<16x128xf32>
    %77 = arith.addf %45, %76 : vector<16x128xf32>
    %c0_30 = arith.constant 0 : index
    %c0_31 = arith.constant 0 : index
    %78 = vector.load %arg3[%c0_30, %c0_31] : memref<8x128xf32, #tpu.memory_space<vmem>>, vector<1x128xf32>
    %79 = vector.broadcast %78 : vector<1x128xf32> to vector<16x128xf32>
    %80 = arith.mulf %74, %79 : vector<16x128xf32>
    %81 = arith.addf %77, %80 : vector<16x128xf32>
    %c127_i32 = arith.constant 127 : i32
    %82 = tpu.dynamic_rotate %74 by %c127_i32 dim 1 : vector<16x128xf32>, i32 -> vector<16x128xf32>
    %c3_i32_32 = arith.constant 3 : i32
    %83 = tpu.dynamic_rotate %74 by %c3_i32_32 dim 1 : vector<16x128xf32>, i32 -> vector<16x128xf32>
    %84 = arith.select %26, %82, %83 : vector<16x128xi1>, vector<16x128xf32>
    %c1_33 = arith.constant 1 : index
    %c0_34 = arith.constant 0 : index
    %85 = vector.load %arg3[%c1_33, %c0_34] : memref<8x128xf32, #tpu.memory_space<vmem>>, vector<1x128xf32>
    %86 = vector.broadcast %85 : vector<1x128xf32> to vector<16x128xf32>
    %87 = arith.mulf %84, %86 : vector<16x128xf32>
    %88 = arith.addf %81, %87 : vector<16x128xf32>
    %c126_i32 = arith.constant 126 : i32
    %89 = tpu.dynamic_rotate %74 by %c126_i32 dim 1 : vector<16x128xf32>, i32 -> vector<16x128xf32>
    %c2_i32_35 = arith.constant 2 : i32
    %90 = tpu.dynamic_rotate %74 by %c2_i32_35 dim 1 : vector<16x128xf32>, i32 -> vector<16x128xf32>
    %91 = arith.select %30, %89, %90 : vector<16x128xi1>, vector<16x128xf32>
    %c2_36 = arith.constant 2 : index
    %c0_37 = arith.constant 0 : index
    %92 = vector.load %arg3[%c2_36, %c0_37] : memref<8x128xf32, #tpu.memory_space<vmem>>, vector<1x128xf32>
    %93 = vector.broadcast %92 : vector<1x128xf32> to vector<16x128xf32>
    %94 = arith.mulf %91, %93 : vector<16x128xf32>
    %95 = arith.addf %88, %94 : vector<16x128xf32>
    %c125_i32 = arith.constant 125 : i32
    %96 = tpu.dynamic_rotate %74 by %c125_i32 dim 1 : vector<16x128xf32>, i32 -> vector<16x128xf32>
    %c1_i32_38 = arith.constant 1 : i32
    %97 = tpu.dynamic_rotate %74 by %c1_i32_38 dim 1 : vector<16x128xf32>, i32 -> vector<16x128xf32>
    %98 = arith.select %34, %96, %97 : vector<16x128xi1>, vector<16x128xf32>
    %c3_39 = arith.constant 3 : index
    %c0_40 = arith.constant 0 : index
    %99 = vector.load %arg3[%c3_39, %c0_40] : memref<8x128xf32, #tpu.memory_space<vmem>>, vector<1x128xf32>
    %100 = vector.broadcast %99 : vector<1x128xf32> to vector<16x128xf32>
    %101 = arith.mulf %98, %100 : vector<16x128xf32>
    %102 = arith.addf %95, %101 : vector<16x128xf32>
    %cst_41 = arith.constant 0.000000e+00 : f32
    %103 = vector.broadcast %cst_41 : f32 to vector<16x128xf32>
    %104 = arith.maximumf %102, %103 : vector<16x128xf32>
    %c1_42 = arith.constant 1 : index
    %c0_43 = arith.constant 0 : index
    %105 = vector.load %arg6[%c1_42, %c0_43] : memref<18x128xf32, #tpu.memory_space<vmem>>, vector<16x128xf32>
    tpu.vector_store %arg6[%c1_42, %c0_43], %104 {strides = array<i32>} : memref<18x128xf32, #tpu.memory_space<vmem>>, vector<16x128xf32>,
    %c0_44 = arith.constant 0 : index
    %c0_45 = arith.constant 0 : index
    %106 = vector.load %arg6[%c0_44, %c0_45] : memref<18x128xf32, #tpu.memory_space<vmem>>, vector<16x128xf32>
    %c9 = arith.constant 9 : index
    %c0_46 = arith.constant 0 : index
    %107 = vector.load %arg2[%c9, %c0_46] : memref<18x128xf32, #tpu.memory_space<vmem>>, vector<1x128xf32>
    %108 = vector.broadcast %107 : vector<1x128xf32> to vector<16x128xf32>
    %109 = arith.mulf %106, %108 : vector<16x128xf32>
    %c10 = arith.constant 10 : index
    %c0_47 = arith.constant 0 : index
    %110 = vector.load %arg2[%c10, %c0_47] : memref<18x128xf32, #tpu.memory_space<vmem>>, vector<1x128xf32>
    %111 = vector.broadcast %110 : vector<1x128xf32> to vector<16x128xf32>
    %112 = arith.mulf %106, %111 : vector<16x128xf32>
    %c11 = arith.constant 11 : index
    %c0_48 = arith.constant 0 : index
    %113 = vector.load %arg2[%c11, %c0_48] : memref<18x128xf32, #tpu.memory_space<vmem>>, vector<1x128xf32>
    %114 = vector.broadcast %113 : vector<1x128xf32> to vector<16x128xf32>
    %115 = arith.mulf %106, %114 : vector<16x128xf32>
    %c1_49 = arith.constant 1 : index
    %c0_50 = arith.constant 0 : index
    %116 = vector.load %arg6[%c1_49, %c0_50] : memref<18x128xf32, #tpu.memory_space<vmem>>, vector<16x128xf32>
    %c12 = arith.constant 12 : index
    %c0_51 = arith.constant 0 : index
    %117 = vector.load %arg2[%c12, %c0_51] : memref<18x128xf32, #tpu.memory_space<vmem>>, vector<1x128xf32>
    %118 = vector.broadcast %117 : vector<1x128xf32> to vector<16x128xf32>
    %119 = arith.mulf %116, %118 : vector<16x128xf32>
    %120 = arith.addf %109, %119 : vector<16x128xf32>
    %c13 = arith.constant 13 : index
    %c0_52 = arith.constant 0 : index
    %121 = vector.load %arg2[%c13, %c0_52] : memref<18x128xf32, #tpu.memory_space<vmem>>, vector<1x128xf32>
    %122 = vector.broadcast %121 : vector<1x128xf32> to vector<16x128xf32>
    %123 = arith.mulf %116, %122 : vector<16x128xf32>
    %124 = arith.addf %112, %123 : vector<16x128xf32>
    %c14 = arith.constant 14 : index
    %c0_53 = arith.constant 0 : index
    %125 = vector.load %arg2[%c14, %c0_53] : memref<18x128xf32, #tpu.memory_space<vmem>>, vector<1x128xf32>
    %126 = vector.broadcast %125 : vector<1x128xf32> to vector<16x128xf32>
    %127 = arith.mulf %116, %126 : vector<16x128xf32>
    %128 = arith.addf %115, %127 : vector<16x128xf32>
    %c2_54 = arith.constant 2 : index
    %c0_55 = arith.constant 0 : index
    %129 = vector.load %arg6[%c2_54, %c0_55] : memref<18x128xf32, #tpu.memory_space<vmem>>, vector<16x128xf32>
    %c15 = arith.constant 15 : index
    %c0_56 = arith.constant 0 : index
    %130 = vector.load %arg2[%c15, %c0_56] : memref<18x128xf32, #tpu.memory_space<vmem>>, vector<1x128xf32>
    %131 = vector.broadcast %130 : vector<1x128xf32> to vector<16x128xf32>
    %132 = arith.mulf %129, %131 : vector<16x128xf32>
    %133 = arith.addf %120, %132 : vector<16x128xf32>
    %c16 = arith.constant 16 : index
    %c0_57 = arith.constant 0 : index
    %134 = vector.load %arg2[%c16, %c0_57] : memref<18x128xf32, #tpu.memory_space<vmem>>, vector<1x128xf32>
    %135 = vector.broadcast %134 : vector<1x128xf32> to vector<16x128xf32>
    %136 = arith.mulf %129, %135 : vector<16x128xf32>
    %137 = arith.addf %124, %136 : vector<16x128xf32>
    %c17_58 = arith.constant 17 : index
    %c0_59 = arith.constant 0 : index
    %138 = vector.load %arg2[%c17_58, %c0_59] : memref<18x128xf32, #tpu.memory_space<vmem>>, vector<1x128xf32>
    %139 = vector.broadcast %138 : vector<1x128xf32> to vector<16x128xf32>
    %140 = arith.mulf %129, %139 : vector<16x128xf32>
    %141 = arith.addf %128, %140 : vector<16x128xf32>
    %c4_i32_60 = arith.constant 4 : i32
    %142 = tpu.dynamic_rotate %133 by %c4_i32_60 dim 1 : vector<16x128xf32>, i32 -> vector<16x128xf32>
    %143 = arith.addf %137, %142 : vector<16x128xf32>
    %c124_i32_61 = arith.constant 124 : i32
    %144 = tpu.dynamic_rotate %141 by %c124_i32_61 dim 1 : vector<16x128xf32>, i32 -> vector<16x128xf32>
    %145 = arith.addf %143, %144 : vector<16x128xf32>
    %c1_62 = arith.constant 1 : index
    %c0_63 = arith.constant 0 : index
    %146 = vector.load %arg4[%c1_62, %c0_63] : memref<2x128xf32, #tpu.memory_space<vmem>>, vector<1x128xf32>
    %147 = vector.broadcast %146 : vector<1x128xf32> to vector<16x128xf32>
    %148 = arith.addf %116, %147 : vector<16x128xf32>
    %c4_64 = arith.constant 4 : index
    %c0_65 = arith.constant 0 : index
    %149 = vector.load %arg3[%c4_64, %c0_65] : memref<8x128xf32, #tpu.memory_space<vmem>>, vector<1x128xf32>
    %150 = vector.broadcast %149 : vector<1x128xf32> to vector<16x128xf32>
    %151 = arith.mulf %145, %150 : vector<16x128xf32>
    %152 = arith.addf %148, %151 : vector<16x128xf32>
    %c127_i32_66 = arith.constant 127 : i32
    %153 = tpu.dynamic_rotate %145 by %c127_i32_66 dim 1 : vector<16x128xf32>, i32 -> vector<16x128xf32>
    %c3_i32_67 = arith.constant 3 : i32
    %154 = tpu.dynamic_rotate %145 by %c3_i32_67 dim 1 : vector<16x128xf32>, i32 -> vector<16x128xf32>
    %155 = arith.select %26, %153, %154 : vector<16x128xi1>, vector<16x128xf32>
    %c5_68 = arith.constant 5 : index
    %c0_69 = arith.constant 0 : index
    %156 = vector.load %arg3[%c5_68, %c0_69] : memref<8x128xf32, #tpu.memory_space<vmem>>, vector<1x128xf32>
    %157 = vector.broadcast %156 : vector<1x128xf32> to vector<16x128xf32>
    %158 = arith.mulf %155, %157 : vector<16x128xf32>
    %159 = arith.addf %152, %158 : vector<16x128xf32>
    %c126_i32_70 = arith.constant 126 : i32
    %160 = tpu.dynamic_rotate %145 by %c126_i32_70 dim 1 : vector<16x128xf32>, i32 -> vector<16x128xf32>
    %c2_i32_71 = arith.constant 2 : i32
    %161 = tpu.dynamic_rotate %145 by %c2_i32_71 dim 1 : vector<16x128xf32>, i32 -> vector<16x128xf32>
    %162 = arith.select %30, %160, %161 : vector<16x128xi1>, vector<16x128xf32>
    %c6_72 = arith.constant 6 : index
    %c0_73 = arith.constant 0 : index
    %163 = vector.load %arg3[%c6_72, %c0_73] : memref<8x128xf32, #tpu.memory_space<vmem>>, vector<1x128xf32>
    %164 = vector.broadcast %163 : vector<1x128xf32> to vector<16x128xf32>
    %165 = arith.mulf %162, %164 : vector<16x128xf32>
    %166 = arith.addf %159, %165 : vector<16x128xf32>
    %c125_i32_74 = arith.constant 125 : i32
    %167 = tpu.dynamic_rotate %145 by %c125_i32_74 dim 1 : vector<16x128xf32>, i32 -> vector<16x128xf32>
    %c1_i32_75 = arith.constant 1 : i32
    %168 = tpu.dynamic_rotate %145 by %c1_i32_75 dim 1 : vector<16x128xf32>, i32 -> vector<16x128xf32>
    %169 = arith.select %34, %167, %168 : vector<16x128xi1>, vector<16x128xf32>
    %c7_76 = arith.constant 7 : index
    %c0_77 = arith.constant 0 : index
    %170 = vector.load %arg3[%c7_76, %c0_77] : memref<8x128xf32, #tpu.memory_space<vmem>>, vector<1x128xf32>
    %171 = vector.broadcast %170 : vector<1x128xf32> to vector<16x128xf32>
    %172 = arith.mulf %169, %171 : vector<16x128xf32>
    %173 = arith.addf %166, %172 : vector<16x128xf32>
    %cst_78 = arith.constant 0.000000e+00 : f32
    %174 = vector.broadcast %cst_78 : f32 to vector<16x128xf32>
    %175 = arith.maximumf %173, %174 : vector<16x128xf32>
    %c0_79 = arith.constant 0 : index
    %c0_80 = arith.constant 0 : index
    %176 = vector.load %arg5[%c0_79, %c0_80] : memref<16x128xf32, #tpu.memory_space<vmem>>, vector<16x128xf32>
    tpu.vector_store %arg5[%c0_79, %c0_80], %175 {strides = array<i32>} : memref<16x128xf32, #tpu.memory_space<vmem>>, vector<16x128xf32>,
    return
  }
  func.func @transform_0(%arg0: i32) -> (i32, i32) {
    %c0_i32 = arith.constant 0 : i32
    %c0_i32_0 = arith.constant 0 : i32
    %c0_i32_1 = arith.constant 0 : i32
    return %c0_i32, %c0_i32_0 : i32, i32
  }
  func.func @transform_1(%arg0: i32) -> (i32, i32) {
    %c0_i32 = arith.constant 0 : i32
    %c0_i32_0 = arith.constant 0 : i32
    %c0_i32_1 = arith.constant 0 : i32
    return %c0_i32, %c0_i32_0 : i32, i32
  }
  func.func @transform_2(%arg0: i32) -> (i32, i32) {
    %c0_i32 = arith.constant 0 : i32
    %c0_i32_0 = arith.constant 0 : i32
    %c0_i32_1 = arith.constant 0 : i32
    return %c0_i32, %c0_i32_0 : i32, i32
  }
  func.func @transform_3(%arg0: i32) -> (i32, i32) {
    %c0_i32 = arith.constant 0 : i32
    %c0_i32_0 = arith.constant 0 : i32
    %c0_i32_1 = arith.constant 0 : i32
    return %c0_i32, %c0_i32_0 : i32, i32
  }
  func.func @transform_4(%arg0: i32) -> (i32, i32) {
    %c0_i32 = arith.constant 0 : i32
    %c0_i32_0 = arith.constant 0 : i32
    %c0_i32_1 = arith.constant 0 : i32
    return %c0_i32, %c0_i32_0 : i32, i32
  }
}

</mosaic_0001>

<bundles_post_ra>
// kernel: tpu_custom_call.1
= control target key start
LH: loop header
LB: loop body
LE: loop exit
PB: predicated region body
PF: predicated region fallthrough
CT: control target
= control target key end

     0   :  { %9 = vsyncpa [#allocation4], 0  ;;  %s773_s0 = inlined_call_operand.hbm [shape: f32[16,128], index: 0, kind: input, shape index: {}]   ;;  %s774_s1 = inlined_call_operand.hbm [shape: f32[18,128], index: 1, kind: input, shape index: {}]   ;;  %s775_s2 = inlined_call_operand.hbm [shape: f32[8,128], index: 2, kind: input, shape index: {}]   ;;  %s776_s3 = inlined_call_operand.vmem [shape: f32[2,128], index: 3, kind: input, shape index: {}]   ;;  %s777_s4 = inlined_call_operand.hbm [shape: f32[16,128], index: 4, kind: output, shape index: {}]  }
   0x1   :  { %10 = vsyncpa [#allocation7], 0 }
   0x2   :  { %11 = vsyncpa [#allocation5], 0  ;;  %s581_s15 = smov [#allocation6]   ;;  %s582_s17 = smov [#allocation3]  }
   0x3   :  { %s29_s16 = sshll.u32 %s581_s15, 4  ;;  %s17_s18 = sshll.u32 %s582_s17, 4  ;;  %s30_s16 = int_to_ptr.vmem [resolvable:$true] %s29_s16  ;;  %s621_s18 = int_to_ptr.vmem [resolvable:$true] %s17_s18 }
   0x4   :  { %s487_s21 = scalar_lea.hbm %s774_s1, 384 }
   0x5   :  { %p488_p0 = scmp.ne.s32.totalorder %s774_s1, %s487_s21  ;;  %p491_p1 = scmp.lt.u32.totalorder %s487_s21, %s774_s1 }
   0x7   :  { %p493_p2 = pnand %p491_p1, %p488_p0 }
   0x9   :  { %496 = shalt.err (!%p493_p2)
}
   0xa   :  { %s497_s26 = scalar_lea.vmem %s30_s16, 384  ;;  %p502_p4 = scmp.lt.s32.totalorder %s30_s16, %s30_s16 }
   0xb   :  { %p498_p3 = scmp.ne.s32.totalorder %s30_s16, %s497_s26  ;;  %p503_p5 = scmp.lt.s32.totalorder %s497_s26, %s497_s26 }
   0xd   :  { %p504_p6 = por %p503_p5, %p502_p4 }
   0xf   :  { %p505_p7 = pnand %p504_p6, %p498_p3 }
  0x11   :  { %508 = shalt.err (!%p505_p7)
}
  0x12   :  { %s583_s27 = smov 128   ;;  %s584_s28 = smov 8  }
  0x13   :  { %35 = dma.hbm_to_vmem [thread:$0]  %s774_s1, 384, %s30_s16, [#allocation7], %s583_s27, %s583_s27, %s584_s28  }
  0x14   :  { %s509_s7 = scalar_lea.hbm %s773_s0, 256 }
  0x15   :  { %p510_p8 = scmp.ne.s32.totalorder %s773_s0, %s509_s7  ;;  %p513_p9 = scmp.lt.u32.totalorder %s509_s7, %s773_s0 }
  0x17   :  { %p515_p10 = pnand %p513_p9, %p510_p8 }
  0x19   :  { %518 = shalt.err (!%p515_p10)
}
  0x1a   :  { %s519_s12 = scalar_lea.vmem %s621_s18, 256  ;;  %p524_p12 = scmp.lt.s32.totalorder %s621_s18, %s621_s18 }
  0x1b   :  { %p520_p11 = scmp.ne.s32.totalorder %s621_s18, %s519_s12  ;;  %p525_p13 = scmp.lt.s32.totalorder %s519_s12, %s519_s12 }
  0x1d   :  { %p526_p0 = por %p525_p13, %p524_p12 }
  0x1f   :  { %p527_p1 = pnand %p526_p0, %p520_p11 }
  0x21   :  { %530 = shalt.err (!%p527_p1)
}
  0x22   :  { %23 = dma.hbm_to_vmem [thread:$0]  %s773_s0, 256, %s621_s18, [#allocation4], %s583_s27, %s583_s27, %s584_s28  }
  0x23   :  { %s585_s14 = smov [#allocation8]   ;;  %s531_s19 = scalar_lea.hbm %s775_s2, 128 }
  0x24   :  { %s42_s15 = sshll.u32 %s585_s14, 4  ;;  %p532_p2 = scmp.ne.s32.totalorder %s775_s2, %s531_s19  ;;  %s43_s15 = int_to_ptr.vmem [resolvable:$true] %s42_s15 }
  0x25   :  { %p535_p3 = scmp.lt.u32.totalorder %s531_s19, %s775_s2 }
  0x27   :  { %p537_p4 = pnand %p535_p3, %p532_p2 }
  0x29   :  { %540 = shalt.err (!%p537_p4)
}
  0x2a   :  { %s541_s24 = scalar_lea.vmem %s43_s15, 128  ;;  %p546_p6 = scmp.lt.s32.totalorder %s43_s15, %s43_s15 }
  0x2b   :  { %p542_p5 = scmp.ne.s32.totalorder %s43_s15, %s541_s24  ;;  %p547_p7 = scmp.lt.s32.totalorder %s541_s24, %s541_s24 }
  0x2d   :  { %p548_p8 = por %p547_p7, %p546_p6 }
  0x2f   :  { %p549_p9 = pnand %p548_p8, %p542_p5 }
  0x31   :  { %552 = shalt.err (!%p549_p9)
}
  0x32   :  { %45 = dma.hbm_to_vmem [thread:$0]  %s775_s2, 128, %s43_s15, [#allocation7]  }
  0x33   :  { %575 = dma.done.wait [#allocation4], 256  }
  0x34   :  { %576 = vsyncadd [#allocation4], 4294967040 }
  0x35   :  { %577 = dma.done.wait [#allocation7], 512  }
  0x36   :  { %578 = vsyncadd [#allocation7], 4294966784  ;;  %v586_v0 = vmov 0.0   ;;  %v59_v1 = vld [vmem:[#allocation3] sm:$0xff]  ;;  %v670_v2 = vld [vmem:[#allocation3 + $0x8] sm:$0xff]  ;;  %s587_s2 = smov 4   ;;  %v63_v62 = vlaneseq }
  0x37   :  { %57 = vst [vmem:[#allocation2] sm:$0x1] %v586_v0  ;;  %58 = vst [vmem:[#allocation2 + $0x11] sm:$0x1] %v586_v0  ;;  %v447_v3 = vld [vmem:[#allocation6 + $0x3] ss:$0 sm:$0xff] }
  0x38   :  { %61 = vst [vmem:[#allocation2 + $0x1] sm:$0xff] %v59_v1  ;;  %62 = vst [vmem:[#allocation2 + $0x9] sm:$0xff] %v670_v2  ;;  %v449_v4 = vld [vmem:[#allocation6 + $0x5] ss:$0 sm:$0xff]  ;;  %v444_v5 = vld [vmem:[#allocation6] ss:$0 sm:$0xff]  ;;  %v116_v8 = vmul.f32 %v447_v3, %v59_v1  ;;  %v117_v9 = vmul.f32 %v447_v3, %v670_v2 }
  0x39   :  { %v450_v6 = vld [vmem:[#allocation6 + $0x6] ss:$0 sm:$0xff]  ;;  %v446_v7 = vld [vmem:[#allocation6 + $0x2] ss:$0 sm:$0xff]  ;;  %v134_v10 = vmul.f32 %v449_v4, %v59_v1  ;;  %v452_v11 = vld [vmem:[#allocation6 + $0x8] ss:$0 sm:$0xff]  ;;  %v135_v15 = vmul.f32 %v449_v4, %v670_v2 }
  0x3a   :  { %s588_s25 = smov 124   ;;  %v445_v33 = vld [vmem:[#allocation6 + $0x1] ss:$0 sm:$0xff]  ;;  %v448_v34 = vld [vmem:[#allocation6 + $0x4] ss:$0 sm:$0xff]  ;;  %s589_s30 = smov 127  }
  0x3b   :  { %v125_v36 = vmul.f32 %v448_v34, %v59_v1  ;;  %v451_v37 = vld [vmem:[#allocation6 + $0x7] ss:$0 sm:$0xff]  ;;  %v126_v41 = vmul.f32 %v448_v34, %v670_v2  ;;  %v453_v47 = vld [vmem:[%s776_s3] ss:$0 sm:$0xff]  ;;  %s590_s5 = smov 3   ;;  %s591_s6 = smov 126  }
  0x3c   :  { %v454_v50 = vld [vmem:[#allocation8] ss:$0 sm:$0xff]  ;;  %v184_v52 = vadd.f32 %v453_v47, %v59_v1  ;;  %v185_v59 = vadd.f32 %v453_v47, %v670_v2  ;;  %s592_s7 = smov 2   ;;  %s593_s8 = smov 125   ;;  %v64_v0 = vand.u32 127, %v63_v62 }
  0x3d   :  { %s594_s9 = smov 1  }
  0x3e   :  { %v696_v3 = vand.u32 3, %v64_v0 }
  0x3f   :  { %v86_v12 = vld [vmem:[#allocation2] sm:$0xff]  ;;  %v87_v13 = vld [vmem:[#allocation2 + $0x8] sm:$0xff] }
  0x40   :  { %v138_v14 = vld [vmem:[#allocation2 + $0x2] sm:$0xff]  ;;  %v93_v16 = vmul.f32 %v444_v5, %v86_v12  ;;  %v94_v17 = vmul.f32 %v444_v5, %v87_v13  ;;  %v139_v18 = vld [vmem:[#allocation2 + $0xa] sm:$0xff]  ;;  %v107_v20 = vmul.f32 %v446_v7, %v86_v12  ;;  %v108_v22 = vmul.f32 %v446_v7, %v87_v13 }
  0x41   :  { %v145_v19 = vmul.f32 %v450_v6, %v138_v14  ;;  %v146_v21 = vmul.f32 %v450_v6, %v139_v18  ;;  %v163_v23 = vmul.f32 %v452_v11, %v138_v14  ;;  %v164_v26 = vmul.f32 %v452_v11, %v139_v18 }
  0x42   :  { %v118_v24 = vadd.f32 %v116_v8, %v93_v16  ;;  %v136_v25 = vadd.f32 %v134_v10, %v107_v20  ;;  %v119_v27 = vadd.f32 %v117_v9, %v94_v17  ;;  %v137_v28 = vadd.f32 %v135_v15, %v108_v22  ;;  %v455_v8 = vld [vmem:[#allocation8 + $0x1] ss:$0 sm:$0xff]  ;;  %v456_v10 = vld [vmem:[#allocation8 + $0x2] ss:$0 sm:$0xff] }
  0x43   :  { %v100_v35 = vmul.f32 %v445_v33, %v86_v12  ;;  %v154_v39 = vmul.f32 %v451_v37, %v138_v14  ;;  %v101_v40 = vmul.f32 %v445_v33, %v87_v13  ;;  %v155_v44 = vmul.f32 %v451_v37, %v139_v18  ;;  %v457_v18 = vld [vmem:[#allocation8 + $0x3] ss:$0 sm:$0xff]  ;;  %v459_v37 = vld [vmem:[#allocation6 + $0xa] ss:$0 sm:$0xff] }
  0x44   :  { %v147_v29 = vadd.f32 %v145_v19, %v118_v24  ;;  %v165_v30 = vadd.f32 %v163_v23, %v136_v25  ;;  %v148_v31 = vadd.f32 %v146_v21, %v119_v27  ;;  %v166_v32 = vadd.f32 %v164_v26, %v137_v28 }
  0x45   :  { %v127_v38 = vadd.f32 %v125_v36, %v100_v35  ;;  %v128_v43 = vadd.f32 %v126_v41, %v101_v40  ;;  %vm77_vm0 = vcmp.lt.s32.totalorder %v696_v3, 3  ;;  %vm80_vm1 = vcmp.lt.s32.totalorder %v696_v3, 2  ;;  %v458_v36 = vld [vmem:[#allocation6 + $0x9] ss:$0 sm:$0xff]  ;;  %v461_v40 = vld [vmem:[#allocation6 + $0xc] ss:$0 sm:$0xff] }
  0x46   :  { %167 = vrot.lane.b32.xlu0 %v147_v29, %s587_s2  ;;  %173 = vrot.lane.b32.xlu1 %v165_v30, %s588_s25  ;;  %vm83_vm2 = vcmp.lt.s32.totalorder %v696_v3, 1 }
  0x47   :  { %v156_v42 = vadd.f32 %v154_v39, %v127_v38  ;;  %v157_v49 = vadd.f32 %v155_v44, %v128_v43  ;;  %v462_v38 = vld [vmem:[#allocation6 + $0xd] ss:$0 sm:$0xff] }
  0x4a   :  { %169 = vrot.lane.b32.xlu0 %v148_v31, %s587_s2  ;;  %175 = vrot.lane.b32.xlu1 %v166_v32, %s588_s25 }
  0xb8   :  { %v168_v45 = vpop.permute.xlu0 %167  ;;  %v174_v46 = vpop.permute.xlu1 %173 }
  0xb9   :  { %v171_v48 = vadd.f32 %v168_v45, %v156_v42  ;;  %v463_v42 = vld [vmem:[#allocation6 + $0xe] ss:$0 sm:$0xff]  ;;  %v464_v45 = vld [vmem:[#allocation6 + $0xf] ss:$0 sm:$0xff] }
  0xbb   :  { %v177_v51 = vadd.f32 %v174_v46, %v171_v48  ;;  %v460_v46 = vld [vmem:[#allocation6 + $0xb] ss:$0 sm:$0xff]  ;;  %v466_v48 = vld [vmem:[#allocation6 + $0x11] ss:$0 sm:$0xff] }
  0xbc   :  { %v170_v53 = vpop.permute.xlu0 %169  ;;  %v176_v54 = vpop.permute.xlu1 %175 }
  0xbd   :  { %v172_v55 = vadd.f32 %v170_v53, %v157_v49  ;;  %195 = vrot.lane.b32.xlu0 %v177_v51, %s589_s30  ;;  %v191_v56 = vmul.f32 %v454_v50, %v177_v51 }
  0xbf   :  { %v178_v57 = vadd.f32 %v176_v54, %v172_v55  ;;  %v193_v58 = vadd.f32 %v191_v56, %v184_v52 }
  0xc1   :  { %199 = vrot.lane.b32.xlu0 %v177_v51, %s590_s5  ;;  %197 = vrot.lane.b32.xlu1 %v178_v57, %s589_s30  ;;  %v192_v60 = vmul.f32 %v454_v50, %v178_v57  ;;  %v465_v50 = vld [vmem:[#allocation6 + $0x10] ss:$0 sm:$0xff] }
  0xc3   :  { %v194_v61 = vadd.f32 %v192_v60, %v185_v59 }
  0xc5   :  { %214 = vrot.lane.b32.xlu0 %v177_v51, %s591_s6  ;;  %201 = vrot.lane.b32.xlu1 %v178_v57, %s590_s5 }
  0xc9   :  { %218 = vrot.lane.b32.xlu0 %v177_v51, %s592_s7  ;;  %216 = vrot.lane.b32.xlu1 %v178_v57, %s591_s6 }
  0xcd   :  { %233 = vrot.lane.b32.xlu0 %v177_v51, %s593_s8  ;;  %220 = vrot.lane.b32.xlu1 %v178_v57, %s592_s7 }
  0xd1   :  { %237 = vrot.lane.b32.xlu0 %v177_v51, %s594_s9  ;;  %235 = vrot.lane.b32.xlu1 %v178_v57, %s593_s8 }
  0xd5   :  { %239 = vrot.lane.b32.xlu1 %v178_v57, %s594_s9 }
 0x12f   :  { %v196_v63 = vpop.permute.xlu0 %195 }
 0x133   :  { %v198_v1 = vpop.permute.xlu1 %197  ;;  %v200_v2 = vpop.permute.xlu0 %199 }
 0x134   :  { %v203_v9 = vsel %vm77_vm0, %v196_v63, %v200_v2 }
 0x135   :  { %v210_v12 = vmul.f32 %v455_v8, %v203_v9 }
 0x137   :  { %v202_v4 = vpop.permute.xlu1 %201  ;;  %v215_v5 = vpop.permute.xlu0 %214  ;;  %v212_v19 = vadd.f32 %v210_v12, %v193_v58 }
 0x138   :  { %v204_v15 = vsel %vm77_vm0, %v198_v1, %v202_v4 }
 0x139   :  { %v211_v20 = vmul.f32 %v455_v8, %v204_v15 }
 0x13b   :  { %v217_v6 = vpop.permute.xlu1 %216  ;;  %v219_v7 = vpop.permute.xlu0 %218  ;;  %v213_v27 = vadd.f32 %v211_v20, %v194_v61  ;;  %v467_v20 = vld [vmem:[%s776_s3 + $0x1] ss:$0 sm:$0xff]  ;;  %s595_s3 = smov [#allocation9]  }
 0x13c   :  { %v222_v11 = vsel %vm80_vm1, %v215_v5, %v219_v7  ;;  %s431_s12 = sshll.u32 %s595_s3, 4  ;;  %s432_s12 = int_to_ptr.vmem [resolvable:$true] %s431_s12 }
 0x13d   :  { %v229_v16 = vmul.f32 %v456_v10, %v222_v11  ;;  %s553_s1 = scalar_lea.vmem %s432_s12, 256  ;;  %p558_p11 = scmp.lt.s32.totalorder %s432_s12, %s432_s12 }
 0x13e   :  { %p554_p10 = scmp.ne.s32.totalorder %s432_s12, %s553_s1  ;;  %p559_p12 = scmp.lt.s32.totalorder %s553_s1, %s553_s1 }
 0x13f   :  { %v221_v13 = vpop.permute.xlu1 %220  ;;  %v234_v14 = vpop.permute.xlu0 %233  ;;  %v231_v24 = vadd.f32 %v229_v16, %v212_v19 }
 0x140   :  { %v223_v17 = vsel %vm80_vm1, %v217_v6, %v221_v13  ;;  %p560_p13 = por %p559_p12, %p558_p11 }
 0x141   :  { %v230_v25 = vmul.f32 %v456_v10, %v223_v17 }
 0x142   :  { %p561_p0 = pnand %p560_p13, %p554_p10 }
 0x143   :  { %v236_v21 = vpop.permute.xlu1 %235  ;;  %v238_v22 = vpop.permute.xlu0 %237  ;;  %v232_v31 = vadd.f32 %v230_v25, %v213_v27 }
 0x144   :  { %v241_v23 = vsel %vm83_vm2, %v234_v14, %v238_v22 }
 0x145   :  { %v248_v26 = vmul.f32 %v457_v18, %v241_v23 }
 0x147   :  { %v250_v28 = vadd.f32 %v248_v26, %v231_v24  ;;  %v240_v29 = vpop.permute.xlu1 %239 }
 0x148   :  { %v242_v30 = vsel %vm83_vm2, %v236_v21, %v240_v29  ;;  %v468_v21 = vld [vmem:[#allocation8 + $0x4] ss:$0 sm:$0xff] }
 0x149   :  { %v713_v32 = vmax.f32 %v250_v28, 0.0  ;;  %v249_v33 = vmul.f32 %v457_v18, %v242_v30 }
 0x14b   :  { %254 = vst [vmem:[#allocation2 + $0x1] sm:$0xff] %v713_v32  ;;  %v251_v34 = vadd.f32 %v249_v33, %v232_v31  ;;  %v295_v44 = vmul.f32 %v462_v38, %v713_v32  ;;  %v286_v47 = vmul.f32 %v461_v40, %v713_v32  ;;  %v304_v55 = vmul.f32 %v463_v42, %v713_v32 }
 0x14c   :  { %v354_v26 = vadd.f32 %v467_v20, %v713_v32 }
 0x14d   :  { %v716_v35 = vmax.f32 %v251_v34, 0.0 }
 0x14f   :  { %255 = vst [vmem:[#allocation2 + $0x9] sm:$0xff] %v716_v35  ;;  %v287_v53 = vmul.f32 %v461_v40, %v716_v35  ;;  %v305_v56 = vmul.f32 %v463_v42, %v716_v35  ;;  %v296_v0 = vmul.f32 %v462_v38, %v716_v35  ;;  %v355_v29 = vadd.f32 %v467_v20, %v716_v35 }
 0x152   :  { %v256_v39 = vld [vmem:[#allocation2] sm:$0xff] }
 0x153   :  { %v263_v41 = vmul.f32 %v458_v36, %v256_v39  ;;  %v270_v43 = vmul.f32 %v459_v37, %v256_v39  ;;  %v277_v60 = vmul.f32 %v460_v46, %v256_v39  ;;  %v469_v39 = vld [vmem:[#allocation8 + $0x5] ss:$0 sm:$0xff] }
 0x155   :  { %v297_v49 = vadd.f32 %v295_v44, %v270_v43  ;;  %v288_v57 = vadd.f32 %v286_v47, %v263_v41  ;;  %v306_v10 = vadd.f32 %v304_v55, %v277_v60  ;;  %v470_v43 = vld [vmem:[#allocation8 + $0x6] ss:$0 sm:$0xff] }
 0x156   :  { %v308_v51 = vld [vmem:[#allocation2 + $0x2] sm:$0xff]  ;;  %v309_v54 = vld [vmem:[#allocation2 + $0xa] sm:$0xff] }
 0x157   :  { %v257_v52 = vld [vmem:[#allocation2 + $0x8] sm:$0xff]  ;;  %v315_v58 = vmul.f32 %v464_v45, %v308_v51  ;;  %v324_v62 = vmul.f32 %v465_v50, %v308_v51  ;;  %v316_v4 = vmul.f32 %v464_v45, %v309_v54  ;;  %v333_v5 = vmul.f32 %v466_v48, %v308_v51  ;;  %v471_v51 = vld [vmem:[#allocation8 + $0x7] ss:$0 sm:$0xff] }
 0x158   :  { %v264_v59 = vmul.f32 %v458_v36, %v257_v52  ;;  %v278_v61 = vmul.f32 %v460_v46, %v257_v52  ;;  %v271_v63 = vmul.f32 %v459_v37, %v257_v52  ;;  %v325_v8 = vmul.f32 %v465_v50, %v309_v54 }
 0x159   :  { %v317_v1 = vadd.f32 %v315_v58, %v288_v57  ;;  %v326_v6 = vadd.f32 %v324_v62, %v297_v49  ;;  %v335_v13 = vadd.f32 %v333_v5, %v306_v10  ;;  %v334_v14 = vmul.f32 %v466_v48, %v309_v54 }
 0x15a   :  { %v289_v2 = vadd.f32 %v287_v53, %v264_v59  ;;  %v298_v7 = vadd.f32 %v296_v0, %v271_v63  ;;  %v307_v11 = vadd.f32 %v305_v56, %v278_v61 }
 0x15b   :  { %337 = vrot.lane.b32.xlu0 %v317_v1, %s587_s2 }
 0x15c   :  { %v318_v9 = vadd.f32 %v316_v4, %v289_v2  ;;  %v327_v12 = vadd.f32 %v325_v8, %v298_v7  ;;  %v336_v15 = vadd.f32 %v334_v14, %v307_v11 }
 0x15e   :  { %339 = vrot.lane.b32.xlu1 %v318_v9, %s587_s2 }
 0x15f   :  { %343 = vrot.lane.b32.xlu0 %v335_v13, %s588_s25 }
 0x162   :  { %345 = vrot.lane.b32.xlu1 %v336_v15, %s588_s25 }
 0x1cd   :  { %v338_v16 = vpop.permute.xlu0 %337 }
 0x1ce   :  { %v341_v18 = vadd.f32 %v338_v16, %v326_v6 }
 0x1d0   :  { %v340_v17 = vpop.permute.xlu1 %339 }
 0x1d1   :  { %v344_v19 = vpop.permute.xlu0 %343  ;;  %v342_v22 = vadd.f32 %v340_v17, %v327_v12 }
 0x1d2   :  { %v347_v23 = vadd.f32 %v344_v19, %v341_v18 }
 0x1d4   :  { %v346_v24 = vpop.permute.xlu1 %345  ;;  %365 = vrot.lane.b32.xlu0 %v347_v23, %s589_s30  ;;  %v361_v27 = vmul.f32 %v468_v21, %v347_v23 }
 0x1d5   :  { %v348_v25 = vadd.f32 %v346_v24, %v342_v22 }
 0x1d6   :  { %v363_v28 = vadd.f32 %v361_v27, %v354_v26 }
 0x1d7   :  { %367 = vrot.lane.b32.xlu1 %v348_v25, %s589_s30  ;;  %v362_v30 = vmul.f32 %v468_v21, %v348_v25 }
 0x1d8   :  { %369 = vrot.lane.b32.xlu0 %v347_v23, %s590_s5 }
 0x1d9   :  { %v364_v31 = vadd.f32 %v362_v30, %v355_v29 }
 0x1db   :  { %371 = vrot.lane.b32.xlu1 %v348_v25, %s590_s5 }
 0x1dc   :  { %384 = vrot.lane.b32.xlu0 %v347_v23, %s591_s6 }
 0x1df   :  { %386 = vrot.lane.b32.xlu1 %v348_v25, %s591_s6 }
 0x1e0   :  { %388 = vrot.lane.b32.xlu0 %v347_v23, %s592_s7 }
 0x1e3   :  { %390 = vrot.lane.b32.xlu1 %v348_v25, %s592_s7 }
 0x1e4   :  { %403 = vrot.lane.b32.xlu0 %v347_v23, %s593_s8 }
 0x1e7   :  { %405 = vrot.lane.b32.xlu1 %v348_v25, %s593_s8 }
 0x1e8   :  { %407 = vrot.lane.b32.xlu0 %v347_v23, %s594_s9 }
 0x1eb   :  { %409 = vrot.lane.b32.xlu1 %v348_v25, %s594_s9 }
 0x246   :  { %v366_v32 = vpop.permute.xlu0 %365 }
 0x249   :  { %v368_v33 = vpop.permute.xlu1 %367 }
 0x24a   :  { %v370_v34 = vpop.permute.xlu0 %369 }
 0x24b   :  { %v373_v40 = vsel %vm77_vm0, %v366_v32, %v370_v34 }
 0x24c   :  { %v380_v45 = vmul.f32 %v469_v39, %v373_v40 }
 0x24d   :  { %v372_v35 = vpop.permute.xlu1 %371 }
 0x24e   :  { %v385_v36 = vpop.permute.xlu0 %384  ;;  %v374_v42 = vsel %vm77_vm0, %v368_v33, %v372_v35  ;;  %v382_v52 = vadd.f32 %v380_v45, %v363_v28 }
 0x24f   :  { %v381_v48 = vmul.f32 %v469_v39, %v374_v42 }
 0x251   :  { %v387_v37 = vpop.permute.xlu1 %386  ;;  %v383_v56 = vadd.f32 %v381_v48, %v364_v31 }
 0x252   :  { %v389_v38 = vpop.permute.xlu0 %388 }
 0x253   :  { %v392_v44 = vsel %vm80_vm1, %v385_v36, %v389_v38 }
 0x254   :  { %v399_v49 = vmul.f32 %v470_v43, %v392_v44 }
 0x255   :  { %v391_v41 = vpop.permute.xlu1 %390 }
 0x256   :  { %v404_v46 = vpop.permute.xlu0 %403  ;;  %v393_v47 = vsel %vm80_vm1, %v387_v37, %v391_v41  ;;  %v401_v57 = vadd.f32 %v399_v49, %v382_v52 }
 0x257   :  { %v400_v53 = vmul.f32 %v470_v43, %v393_v47 }
 0x259   :  { %v406_v50 = vpop.permute.xlu1 %405  ;;  %v402_v61 = vadd.f32 %v400_v53, %v383_v56 }
 0x25a   :  { %v408_v54 = vpop.permute.xlu0 %407 }
 0x25b   :  { %v411_v55 = vsel %vm83_vm2, %v404_v46, %v408_v54 }
 0x25c   :  { %v418_v58 = vmul.f32 %v471_v51, %v411_v55 }
 0x25d   :  { %v410_v59 = vpop.permute.xlu1 %409 }
 0x25e   :  { %v412_v60 = vsel %vm83_vm2, %v406_v50, %v410_v59  ;;  %v420_v62 = vadd.f32 %v418_v58, %v401_v57 }
 0x25f   :  { %v419_v63 = vmul.f32 %v471_v51, %v412_v60 }
 0x260   :  { %v422_v0 = vmax.f32 %v420_v62, 0.0 }
 0x261   :  { %v421_v1 = vadd.f32 %v419_v63, %v402_v61 }
 0x262   :  { %424 = vst [vmem:[#allocation9] sm:$0xff] %v422_v0 }
 0x263   :  { %v423_v2 = vmax.f32 %v421_v1, 0.0 }
 0x265   :  { %425 = vst [vmem:[#allocation9 + $0x8] sm:$0xff] %v423_v2 }
 0x266   :  { %564 = shalt.err (!%p561_p0)
}
 0x267   :  { %s565_s15 = scalar_lea.hbm %s777_s4, 256 }
 0x268   :  { %p566_p1 = scmp.ne.s32.totalorder %s777_s4, %s565_s15  ;;  %p569_p2 = scmp.lt.u32.totalorder %s565_s15, %s777_s4 }
 0x26a   :  { %p571_p3 = pnand %p569_p2, %p566_p1 }
 0x26c   :  { %574 = shalt.err (!%p571_p3)
}
 0x26d   :  { %437 = dma.vmem_to_hbm [thread:$0]  %s432_s12, 256, %s777_s4, [#allocation5], %s583_s27, %s583_s27, %s584_s28  }
 0x26e   :  { %579 = dma.done.wait [#allocation5], 256  }
 0x26f   :  { %580 = vsyncadd [#allocation5], 4294967040 }
 0x270   :  { %441 = vsyncpa [#allocation4], 1 }
 0x271   :  { %442 = vsyncpa [#allocation7], 1 }
 0x272   :  { %443 = vsyncpa [#allocation5], 1 }

</bundles_post_ra>
